<compile_context>
chip_gen: v7x
topology: tpu7x:2x2x1
jax: 0.10.0
libtpu: 0.0.40
codegen_flags: <defaults>
</compile_context>

<pallas_src>
import jax
import jax.numpy as jnp
from jax.experimental import pallas as pl
from jax.experimental.pallas import tpu as pltpu


def film_kernel(scale_ref, shift_ref, x_ref, o_ref):
    # (Bb, Ct, 1) f32 scale/shift broadcast over the (Bb, Ct, Tt) tile: one FMA
    # in f32, single cast at the store.
    x = x_ref[...].astype(jnp.float32)
    o_ref[...] = (x * scale_ref[...] + shift_ref[...]).astype(o_ref.dtype)


def _target_tile_bytes():
    """Per-tile byte budget by TPU generation (conservative fallback)."""
    try:
        kind = jax.devices()[0].device_kind.lower()
    except Exception:
        kind = ""
    if "v5 lite" in kind or "v5e" in kind or "v5lite" in kind:
        return 2 * 1024 * 1024   # 16 MiB scoped-VMEM default; 4x tile <= 8 MiB
    if "v6" in kind:
        return 4 * 1024 * 1024   # 128 MiB VMEM, 32 MiB scoped default
    if "v7" in kind:
        return 6 * 1024 * 1024   # 3.2 TB/s HBM: bigger tiles amortize step cost
    return 2 * 1024 * 1024       # unknown chip: be conservative


def _tile_sizes(B, C, T, itemsize, target_bytes):
    """Pick (Bb, Ct, Tt): lane-dense tiles near target_bytes, >= 2 grid blocks."""
    LANE = 128
    SUB = 8 * max(1, 4 // max(itemsize, 1))   # sublane multiple for this dtype

    # T (lane) dim: a multiple of 128 near the budget; ragged last block is
    # masked by Pallas.  Only take the full dim when T itself is < 128.
    if T <= LANE:
        Tt = T
    else:
        t_rounded = pl.cdiv(T, LANE) * LANE
        max_lanes = max(LANE, ((target_bytes // max(C * itemsize, 1)) // LANE) * LANE)
        Tt = min(t_rounded, max_lanes)

    # C dim: full C unless a single (1, C, Tt) row already exceeds the budget
    # (very large C); then take a sublane-aligned chunk.
    Ct = C
    if C > SUB and C * Tt * itemsize > target_bytes:
        Ct = min(C, max(SUB, ((target_bytes // max(Tt * itemsize, 1)) // SUB) * SUB))

    row_bytes = Ct * Tt * itemsize
    Bb = int(max(1, min(B, target_bytes // max(row_bytes, 1))))

    # Guarantee >= 2 grid blocks so both TensorCores (v7x) get work and the
    # DMA pipeline has something to overlap with.
    def n_blocks(bb, ct, tt):
        return pl.cdiv(B, bb) * pl.cdiv(C, ct) * pl.cdiv(T, tt)

    if n_blocks(Bb, Ct, Tt) < 2:
        if B > 1:
            Bb = max(1, B // 2)
        elif Tt > LANE:
            Tt = max(LANE, pl.cdiv(Tt, 2 * LANE) * LANE)
        elif Ct > SUB:
            Ct = max(SUB, pl.cdiv(Ct, 2 * SUB) * SUB)
        # else: the whole problem is one tiny tile; nothing worth splitting.

    return Bb, Ct, Tt


def film_pallas(x, temb, W, bias):
    """x: (B, C, T), temb: (B, emb), W: (2*C, emb), bias: (2*C,)."""
    B, C, T = x.shape

    # Hoisted Linear (negligible vs. x/out HBM traffic), kept in f32.
    gb = (temb.astype(jnp.float32) @ W.astype(jnp.float32).T
          + bias.astype(jnp.float32))                          # (B, 2C)
    scale = (1.0 + gb[:, :C])[:, :, None]                      # (B, C, 1) f32
    shift = gb[:, C:][:, :, None]                              # (B, C, 1) f32

    itemsize = jnp.dtype(x.dtype).itemsize
    target_bytes = _target_tile_bytes()
    Bb, Ct, Tt = _tile_sizes(B, C, T, itemsize, target_bytes)
    grid = (pl.cdiv(B, Bb), pl.cdiv(C, Ct), pl.cdiv(T, Tt))

    # Double-buffered x + out tiles plus scale/shift; raise the scoped-VMEM
    # limit only when the footprint actually needs it.
    tile_bytes = Bb * Ct * Tt * itemsize
    vmem_need = 4 * tile_bytes + 4 * Bb * Ct * 4
    vmem_limit = None
    if vmem_need > 12 * 1024 * 1024:
        vmem_limit = min(max(32 * 1024 * 1024, vmem_need * 4 // 3 + (1 << 20)),
                         48 * 1024 * 1024)

    cost = pl.CostEstimate(
        flops=2 * B * C * T,                         # one FMA per element
        transcendentals=0,
        bytes_accessed=2 * B * C * T * itemsize + 2 * B * C * 4,
    )

    return pl.pallas_call(
        film_kernel,
        out_shape=jax.ShapeDtypeStruct((B, C, T), x.dtype),
        grid=grid,
        in_specs=[
            pl.BlockSpec((Bb, Ct, 1), lambda i, c, t: (i, c, 0)),    # scale
            pl.BlockSpec((Bb, Ct, 1), lambda i, c, t: (i, c, 0)),    # shift
            pl.BlockSpec((Bb, Ct, Tt), lambda i, c, t: (i, c, t)),   # x
        ],
        out_specs=pl.BlockSpec((Bb, Ct, Tt), lambda i, c, t: (i, c, t)),
        compiler_params=pltpu.CompilerParams(
            dimension_semantics=("parallel", "parallel", "parallel"),
            vmem_limit_bytes=vmem_limit),
        cost_estimate=cost,
    )(scale, shift, x)


def film_ref(x, temb, W, bias):
    """Pure-JAX reference matching the PyTorch forward exactly."""
    gb = temb @ W.T + bias
    C = x.shape[1]
    g, b = gb[:, :C], gb[:, C:]
    return x * (1.0 + g[:, :, None]) + b[:, :, None]


if __name__ == "__main__":
    B, ch, T, emb = 2, 8, 128, 32

    key = jax.random.PRNGKey(0)
    kx, kt, kw, kb = jax.random.split(key, 4)

    x = jax.random.normal(kx, (B, ch, T), dtype=jnp.float32)
    temb = jax.random.normal(kt, (B, emb), dtype=jnp.float32)

    # Deterministic parameter init (nn.Linear(emb, ch*2) shapes).
    W = jax.random.normal(kw, (2 * ch, emb), dtype=jnp.float32) * 0.1
    bias = jax.random.normal(kb, (2 * ch,), dtype=jnp.float32) * 0.1

    out = jax.block_until_ready(film_pallas(x, temb, W, bias))
    ref = film_ref(x, temb, W, bias)

    assert out.shape == ref.shape and out.dtype == ref.dtype
    assert jnp.allclose(out, ref, atol=1e-5, rtol=1e-5), "mismatch vs reference"

    print("KERNEL_OK")
</pallas_src>

<mosaic_0001>
module attributes {stable_mosaic.version = 11 : i64} {
  func.func @film_kernel(%arg0: i32, %arg1: i32, %arg2: i32, %arg3: memref<1x8x1xf32, #tpu.memory_space<vmem>>, %arg4: memref<1x8x1xf32, #tpu.memory_space<vmem>>, %arg5: memref<1x8x128xf32, #tpu.memory_space<vmem>>, %arg6: memref<1x8x128xf32, #tpu.memory_space<vmem>>) attributes {dimension_semantics = [#tpu.dimension_semantics<parallel>, #tpu.dimension_semantics<parallel>, #tpu.dimension_semantics<parallel>], iteration_bounds = array<i64: 2, 1, 1>, scalar_prefetch = 0 : i64, scratch_operands = 0 : i64, tpu.core_type = #tpu.core_type<tc>, window_params = [{transform_indices = @transform_0, window_bounds = array<i64: 1, 8, 1>}, {transform_indices = @transform_1, window_bounds = array<i64: 1, 8, 1>}, {transform_indices = @transform_2, window_bounds = array<i64: 1, 8, 128>}, {transform_indices = @transform_3, window_bounds = array<i64: 1, 8, 128>}]} {
    %c0 = arith.constant 0 : index
    %c0_0 = arith.constant 0 : index
    %c0_1 = arith.constant 0 : index
    %0 = vector.load %arg5[%c0, %c0_0, %c0_1] : memref<1x8x128xf32, #tpu.memory_space<vmem>>, vector<1x8x128xf32>
    %c0_2 = arith.constant 0 : index
    %c0_3 = arith.constant 0 : index
    %c0_4 = arith.constant 0 : index
    %1 = vector.load %arg3[%c0_2, %c0_3, %c0_4] : memref<1x8x1xf32, #tpu.memory_space<vmem>>, vector<1x8x1xf32>
    %2 = vector.broadcast %1 : vector<1x8x1xf32> to vector<1x8x128xf32>
    %3 = arith.mulf %0, %2 : vector<1x8x128xf32>
    %c0_5 = arith.constant 0 : index
    %c0_6 = arith.constant 0 : index
    %c0_7 = arith.constant 0 : index
    %4 = vector.load %arg4[%c0_5, %c0_6, %c0_7] : memref<1x8x1xf32, #tpu.memory_space<vmem>>, vector<1x8x1xf32>
    %5 = vector.broadcast %4 : vector<1x8x1xf32> to vector<1x8x128xf32>
    %6 = arith.addf %3, %5 : vector<1x8x128xf32>
    %c0_8 = arith.constant 0 : index
    %c0_9 = arith.constant 0 : index
    %c0_10 = arith.constant 0 : index
    %7 = vector.load %arg6[%c0_8, %c0_9, %c0_10] : memref<1x8x128xf32, #tpu.memory_space<vmem>>, vector<1x8x128xf32>
    tpu.vector_store %arg6[%c0_8, %c0_9, %c0_10], %6 {strides = array<i32>} : memref<1x8x128xf32, #tpu.memory_space<vmem>>, vector<1x8x128xf32>,
    return
  }
  func.func @transform_0(%arg0: i32, %arg1: i32, %arg2: i32) -> (i32, i32, i32) {
    %c0_i32 = arith.constant 0 : i32
    %c0_i32_0 = arith.constant 0 : i32
    return %arg0, %arg1, %c0_i32 : i32, i32, i32
  }
  func.func @transform_1(%arg0: i32, %arg1: i32, %arg2: i32) -> (i32, i32, i32) {
    %c0_i32 = arith.constant 0 : i32
    %c0_i32_0 = arith.constant 0 : i32
    return %arg0, %arg1, %c0_i32 : i32, i32, i32
  }
  func.func @transform_2(%arg0: i32, %arg1: i32, %arg2: i32) -> (i32, i32, i32) {
    %c0_i32 = arith.constant 0 : i32
    return %arg0, %arg1, %arg2 : i32, i32, i32
  }
  func.func @transform_3(%arg0: i32, %arg1: i32, %arg2: i32) -> (i32, i32, i32) {
    %c0_i32 = arith.constant 0 : i32
    return %arg0, %arg1, %arg2 : i32, i32, i32
  }
}

</mosaic_0001>

<bundles_post_ra>
// kernel: tpu_custom_call.1
= control target key start
LH: loop header
LB: loop body
LE: loop exit
PB: predicated region body
PF: predicated region fallthrough
CT: control target
= control target key end

     0   :  { %8 = vsyncpa [#allocation3], 0  ;;  %s697_s0 = inlined_call_operand.vmem [shape: f32[2,8,1], index: 0, kind: input, shape index: {}]   ;;  %s698_s1 = inlined_call_operand.vmem [shape: f32[2,8,1], index: 1, kind: input, shape index: {}]   ;;  %s699_s2 = inlined_call_operand.vmem [shape: f32[2,8,128], index: 2, kind: input, shape index: {}]   ;;  %s700_s3 = inlined_call_operand.hbm [shape: f32[2,8,128], index: 3, kind: output, shape index: {}]  }
   0x1   :  { %10 = vsyncpa [#allocation3 + $0x1], 0  ;;  %s579_s12 = smov 0   ;;  %s581_s13 = smov 0  }
   0x2   :  { %s583_s14 = smov 0   ;;  %s585_s15 = smov 0  }
   0x3   :  { %s587_s16 = smov 0   ;;  %s589_s17 = smov 0  }
   0x4 LB: > { %s407_s18 = sadd.s32 4294967295, %s555_s17   ;;  %s408_s19 = sadd.s32 4294967294, %s555_s17   ;;  %s555_s17 = sphi %s589_s17, %s16_s17   ;;  %s551_s16 = sphi %s587_s16, %s707_s16   ;;  %s547_s15 = sphi %s585_s15, %s706_s15   ;;  %s543_s14 = sphi %s583_s14, %s705_s14   ;;  %s539_s13 = sphi %s581_s13, %s704_s13   ;;  %s535_s12 = sphi %s579_s12, %s703_s12  }
   0x5   : > { %s35_s20 = sadd.s32 1, %s551_s16  ;;  %s132_s21 = sadd.s32 1, %s543_s14 }
   0x6   : > { %p37_p0 = scmp.ge.s32.totalorder %s35_s20, 2  ;;  %p142_p1 = scmp.ne.s32.totalorder %s543_s14, %s539_s13 }
   0x7   : > { %p143_p2 = scmp.eq.s32.totalorder %s407_s18, 1  ;;  %p148_p3 = scmp.ne.s32.totalorder %s539_s13, %s535_s12 }
   0x8   : > { %s709_s20 = smov (%p37_p0, %s35_s20), 0  ;;  %p149_p5 = scmp.eq.s32.totalorder %s408_s19, 1 }
   0x9   : > { %p619_p4 = por %p143_p2, %p142_p1  ;;  %s125_s23 = ssub.s32 %s551_s16, %s709_s20 }
   0xa   : > { %p411_p6 = scmp.ge.s32.totalorder %s555_s17, 1  ;;  %p130_p7 = scmp.eq.s32.totalorder %s125_s23, 0 }
   0xb   : > { %p626_p8 = por %p149_p5, %p148_p3  ;;  %p200_p9 = scmp.lt.s32.totalorder %s555_s17, 3 }
   0xc   : > { %s632_s25 = scalar_select %p130_p7, %s543_s14, %s132_s21  }
   0xd   : > { %p201_p10 = pnand %p411_p6, %p200_p9 }
   0xe   : > { %p243_p11 = scmp.lt.s32.totalorder (!%p201_p10), %s547_s15, 1  ;;  %v557_v0 = vmov (!%p201_p10), 0   ;;  %s240_s7 = sand.u32 (!%p201_p10), 1, %s539_s13  }
   0xf   : > { %204 = sbr.rel (%p201_p10) target bundleno = 175 (0xaf), region = 32  ;;  %476 = vset.pattern.permute.xlu0 (!%p201_p10), %v557_v0  ;;  %s412_s8 = sshll.u32 (!%p201_p10), %s240_s7, 3 }
  0x10   : > { %s417_s18 = sshll.u32 (!%p201_p10), %s547_s15, 7  ;;  %s242_s19 = scalar_lea.vmem (!%p201_p10), [#allocation2], %s412_s8 }
  0x11   : > { %s299_s21 = sshll.u32 (!%p201_p10), %s242_s19, 4  ;;  %s650_s28 = scalar_lea.hbm (!%p201_p10), %s700_s3, %s417_s18  ;;  %s652_s21 = int_to_ptr.vmem [resolvable:$true] %s299_s21 }
  0x12   : > { %s477_s29 = scalar_lea.vmem (!%p201_p10), %s652_s21, 128 }
  0x13   : > { %p478_p12 = scmp.ne.s32.totalorder (!%p201_p10), %s652_s21, %s477_s29 }
  0x15   : > { %p479_p13 = pnand (!%p201_p10), %p478_p12, %p619_p4 }
  0x16   : > { %s244_s26 = scalar_select %p243_p11, %s547_s15, 1 }
  0x17   : > { %p480_p0 = pneg %p479_p13  ;;  %s558_s15 = smov [#allocation2]  }
  0x18   : > { %s413_s27 = sshll.u32 %s244_s26, 3 }
  0x19   : > { %s249_s30 = scalar_lea.vmem %s697_s0, %s413_s27  ;;  %s256_s6 = scalar_lea.vmem %s698_s1, %s413_s27 }
  0x1a   : > { %v268_v1 = vld [vmem:[%s249_s30] sm:$0xff]  ;;  %s266_s11 = scalar_lea.vmem %s699_s2, %s413_s27  ;;  %s284_s27 = scalar_lea.sflag [#allocation3], %s240_s7 }
  0x1b   : > { %271 = vperm.xlu0 %476, %v268_v1   ;;  %v275_v2 = vld [vmem:[%s256_s6] sm:$0xff]  ;;  %s481_s30 = sshll.u32 %s558_s15, 4  ;;  %s482_s30 = int_to_ptr.vmem [resolvable:$false] %s481_s30 }
  0x1c   : > { %v267_v3 = vld [vmem:[%s266_s11] sm:$0xff]  ;;  %s483_s4 = scalar_lea.vmem %s482_s30, 256  ;;  %p484_p1 = scmp.lt.s32.totalorder %s652_s21, %s482_s30 }
  0x1d   : > { %p485_p2 = scmp.lt.s32.totalorder %s483_s4, %s477_s29 }
  0x1f   : > { %278 = vperm.xlu0 %476, %v275_v2   ;;  %p486_p3 = por %p485_p2, %p484_p1 }
  0x21   : > { %p487_p5 = pnand %p486_p3, %p480_p0 }
  0x9a   : > { %v272_v4 = vpop.permute.xlu0 %271 }
  0x9b   : > { %v274_v5 = vmul.f32 %v272_v4, %v267_v3 }
  0x9e   : > { %v279_v6 = vpop.permute.xlu0 %278 }
  0x9f   : > { %v281_v7 = vadd.f32 %v279_v6, %v274_v5 }
  0xa1   : > { %282 = vst [vmem:[%s242_s19] sm:$0xff] %v281_v7 }
  0xa2   : > { %490 = shalt.err (!%p487_p5)
}
  0xa3   : > { %s491_s5 = scalar_lea.hbm %s650_s28, 128  ;;  %s495_s8 = scalar_lea.hbm %s700_s3, 256 }
  0xa4   : > { %p492_p6 = scmp.ne.s32.totalorder %s650_s28, %s491_s5  ;;  %p496_p10 = scmp.lt.u32.totalorder %s650_s28, %s700_s3 }
  0xa5   : > { %p497_p11 = scmp.lt.u32.totalorder %s495_s8, %s491_s5  ;;  %p499_p13 = scmp.lt.u32.totalorder %s491_s5, %s650_s28 }
  0xa6   : > { %p493_p7 = pnand %p492_p6, %p619_p4 }
  0xa7   : > { %p498_p12 = por %p497_p11, %p496_p10 }
  0xa8   : > { %p494_p9 = pneg %p493_p7 }
  0xa9   : > { %p500_p0 = por %p499_p13, %p498_p12 }
  0xab   : > { %p501_p1 = pnand %p500_p0, %p494_p9 }
  0xad   : > { %504 = shalt.err (!%p501_p1)
}
  0xae   : > { %420 = dma.vmem_to_hbm [thread:$0]  (%p619_p4), %s652_s21, 128, %s650_s28, %s284_s27  }
  0xaf PF: > { %p426_p2 = scmp.ge.s32.totalorder %s555_s17, 2  ;;  %s311_s11 = sand.u32 1, %s535_s12  }
  0xb0   : > { %s312_s18 = scalar_lea.sflag [#allocation3], %s311_s11 }
  0xb1   : > { %p423_p3 = pnand %p426_p2, %p626_p8 }
  0xb3   : > { %530 = dma.done.wait (!%p423_p3), %s312_s18, 128  }
  0xb4   : > { %532 = vsyncadd (!%p423_p3), %s312_s18, 4294967168  ;;  %s16_s17 = sadd.s32 1, %s555_s17   ;;  %s703_s12 = smov %s539_s13 }
  0xb5   : > { %p13_p5 = scmp.ge.s32.totalorder %s16_s17, 4   ;;  %s704_s13 = smov %s543_s14 }
  0xb6   : > { %s705_s14 = smov %s632_s25  ;;  %s706_s15 = smov %s551_s16 }
  0xb7   : > { %s707_s16 = smov %s709_s20  ;;  %15 = sbr.rel (!%p13_p5) target bundleno = 4 (0x4), region = 73 }
  0xbe   :  { %317 = vsyncpa [#allocation3], 1 }
  0xbf   :  { %319 = vsyncpa [#allocation3 + $0x1], 1 }

</bundles_post_ra>
